<compile_context>
chip_gen: v5e
topology: v5e:2x2
jax: 0.10.0
libtpu: 0.0.40
codegen_flags: <defaults>
</compile_context>

<pallas_src>
import functools

import jax
import jax.numpy as jnp
from jax.experimental import pallas as pl
from jax.experimental.pallas import tpu as pltpu


# ----------------------------------------------------------------------------
# small math helpers usable inside kernels
# ----------------------------------------------------------------------------
def _softplus(x):
    return jnp.maximum(x, 0.0) + jnp.log(1.0 + jnp.exp(-jnp.abs(x)))


def _sigmoid(x):
    return 1.0 / (1.0 + jnp.exp(-x))


def _round_up(x, m):
    return ((x + m - 1) // m) * m


# ----------------------------------------------------------------------------
# Pallas kernel 1: tiled fused matmul + bias + activation (all convs via im2col)
# ----------------------------------------------------------------------------
def _mm_act_kernel(x_ref, w_ref, b_ref, o_ref, acc_ref, *, act):
    @pl.when(pl.program_id(2) == 0)
    def _():
        acc_ref[...] = jnp.zeros_like(acc_ref)

    acc_ref[...] += jnp.dot(x_ref[...], w_ref[...],
                            preferred_element_type=jnp.float32)

    @pl.when(pl.program_id(2) == pl.num_programs(2) - 1)
    def _():
        acc = acc_ref[...] + b_ref[...]
        if act == "relu":
            acc = jnp.maximum(acc, 0.0)
        elif act == "sigmoid":
            acc = _sigmoid(acc)
        o_ref[...] = acc


def pallas_matmul(x, w, b, act="none"):
    """x: (M,K) f32, w: (K,N) f32, b: (N,) f32 -> (M,N) f32.  bf16 MXU, f32 acc."""
    M, K = x.shape
    N = w.shape[1]
    TM, TN, TK, FULL_K_MAX = 512, 256, 512, 4096
    tm = min(TM, _round_up(M, 16))
    tn = min(TN, _round_up(N, 128))
    if K <= FULL_K_MAX:
        # full-extent contraction block: no 128-padding of K (only 16-align for
        # bf16 sublane packing), no K grid loop.
        Kp = _round_up(K, 16)
        tk = Kp
    else:
        tk = TK
        Kp = _round_up(K, tk)
    Mp, Np = _round_up(M, tm), _round_up(N, tn)

    xb = x.astype(jnp.bfloat16)
    wb = w.astype(jnp.bfloat16)
    if Mp > M or Kp > K:
        xb = jnp.pad(xb, ((0, Mp - M), (0, Kp - K)))
    if Kp > K or Np > N:
        wb = jnp.pad(wb, ((0, Kp - K), (0, Np - N)))
    bb = jnp.pad(b.astype(jnp.float32).reshape(1, N), ((0, 0), (0, Np - N)))

    # VMEM ask derived from the actual double-buffered working set (+ headroom)
    tile_bytes = (2 * (tm * tk + tk * tn) * 2      # bf16 inputs, double-buffered
                  + 2 * tm * tn * 4                # f32 output, double-buffered
                  + tm * tn * 4                    # f32 accumulator
                  + 2 * tn * 4)                    # bias
    vmem_limit = int(min(100 * 1024 * 1024, 2 * tile_bytes + (8 << 20)))

    out = pl.pallas_call(
        functools.partial(_mm_act_kernel, act=act),
        out_shape=jax.ShapeDtypeStruct((Mp, Np), jnp.float32),
        grid=(Mp // tm, Np // tn, Kp // tk),
        in_specs=[pl.BlockSpec((tm, tk), lambda i, j, k: (i, k)),
                  pl.BlockSpec((tk, tn), lambda i, j, k: (k, j)),
                  pl.BlockSpec((1, tn), lambda i, j, k: (0, j))],
        out_specs=pl.BlockSpec((tm, tn), lambda i, j, k: (i, j)),
        scratch_shapes=[pltpu.VMEM((tm, tn), jnp.float32)],
        compiler_params=pltpu.CompilerParams(
            dimension_semantics=("parallel", "parallel", "arbitrary"),
            vmem_limit_bytes=vmem_limit),
    )(xb, wb, bb)
    return out[:M, :N]


def conv2d_nhwc(x, w, b, stride=1, pad=1, act="none"):
    """x: (B,H,W,Cin) NHWC, w: (kh,kw,Cin,Cout) -> (B,OH,OW,Cout) NHWC."""
    B, H, W, C = x.shape
    kh, kw, _, Cout = w.shape
    OH = (H + 2 * pad - kh) // stride + 1
    OW = (W + 2 * pad - kw) // stride + 1
    xp = jnp.pad(x, ((0, 0), (pad, pad), (pad, pad), (0, 0)))
    # TODO(synk): fuse im2col into the matmul kernel via halo-window DMA; the
    # 9x patch tensor below is still materialized in HBM (bf16 in the matmul).
    cols = []
    for i in range(kh):
        for j in range(kw):
            cols.append(xp[:, i:i + (OH - 1) * stride + 1:stride,
                           j:j + (OW - 1) * stride + 1:stride, :])
    patches = jnp.concatenate(cols, axis=-1).reshape(B * OH * OW, kh * kw * C)
    wmat = w.reshape(kh * kw * C, Cout)
    out = pallas_matmul(patches, wmat, b, act=act)                  # (B*OH*OW, Cout)
    return out.reshape(B, OH, OW, Cout)


# ----------------------------------------------------------------------------
# Pallas kernel 2: fused global-average-pool + fl / offset heads
# ----------------------------------------------------------------------------
def _pool_heads_kernel(x_ref, w1f, b1f, w2f, b2f, w1o, b1o, w2o, b2o,
                       fl_ref, off_ref):
    pooled = jnp.mean(x_ref[...], axis=1)                           # (B, C)
    hf = jnp.maximum(jnp.dot(pooled, w1f[...],
                             preferred_element_type=jnp.float32) + b1f[...], 0.0)
    fl_ref[...] = _softplus(jnp.dot(hf, w2f[...],
                                    preferred_element_type=jnp.float32) + b2f[...])
    ho = jnp.maximum(jnp.dot(pooled, w1o[...],
                             preferred_element_type=jnp.float32) + b1o[...], 0.0)
    off_ref[...] = _sigmoid(jnp.dot(ho, w2o[...],
                                    preferred_element_type=jnp.float32) + b2o[...])


def pooled_heads_forward(hp, feat):
    """feat: (B,H,W,C) NHWC -> (fl (B,2), offsets (B,2))."""
    B, H, W, C = feat.shape
    xf = feat.reshape(B, H * W, C)
    args = (xf,
            hp["fl_w1"], hp["fl_b1"].reshape(1, -1), hp["fl_w2"], hp["fl_b2"].reshape(1, -1),
            hp["off_w1"], hp["off_b1"].reshape(1, -1), hp["off_w2"], hp["off_b2"].reshape(1, -1))

    def full_spec(a):
        nd = a.ndim
        return pl.BlockSpec(a.shape, lambda i, nd=nd: (0,) * nd)

    fl, off = pl.pallas_call(
        _pool_heads_kernel,
        out_shape=(jax.ShapeDtypeStruct((B, 2), jnp.float32),
                   jax.ShapeDtypeStruct((B, 2), jnp.float32)),
        grid=(1,),
        in_specs=[full_spec(a) for a in args],
        out_specs=(pl.BlockSpec((B, 2), lambda i: (0, 0)),
                   pl.BlockSpec((B, 2), lambda i: (0, 0))),
    )(*args)
    return fl, off


# ----------------------------------------------------------------------------
# Pallas kernel 3: disp_to_depth (elementwise, tiled over batch, exact divide)
# ----------------------------------------------------------------------------
def _d2d_kernel(d_ref, o_ref, *, min_depth, max_depth):
    min_disp = 1.0 / max_depth
    max_disp = 1.0 / min_depth
    scaled = min_disp + (max_disp - min_disp) * d_ref[...]
    o_ref[...] = 1.0 / scaled          # exact divide: depth feeds the geometry


def disp_to_depth(disp, min_depth, max_depth):
    B, C, H, W = disp.shape
    d3 = disp.reshape(B * C, H, W)
    depth = pl.pallas_call(
        functools.partial(_d2d_kernel, min_depth=min_depth, max_depth=max_depth),
        out_shape=jax.ShapeDtypeStruct(d3.shape, jnp.float32),
        grid=(B * C,),
        in_specs=[pl.BlockSpec((1, H, W), lambda b: (b, 0, 0))],
        out_specs=pl.BlockSpec((1, H, W), lambda b: (b, 0, 0)),
        compiler_params=pltpu.CompilerParams(dimension_semantics=("parallel",)),
    )(d3)
    return depth.reshape(B, C, H, W)


# ----------------------------------------------------------------------------
# Pallas kernel 4: BackprojectDepth + Project3D, VPU broadcast FMAs with the
# folded 3x3 transform in SMEM.  Output stays (B,2,H,W).
# ----------------------------------------------------------------------------
def _bp_proj_kernel(par_ref, d_ref, out_ref, *, H, W):
    b = pl.program_id(0)
    x = jax.lax.broadcasted_iota(jnp.int32, (H, W), 1).astype(jnp.float32)
    y = jax.lax.broadcasted_iota(jnp.int32, (H, W), 0).astype(jnp.float32)
    d = d_ref[0]                                                    # (H, W)
    m00 = par_ref[b, 0]; m01 = par_ref[b, 1]; m02 = par_ref[b, 2]
    m10 = par_ref[b, 3]; m11 = par_ref[b, 4]; m12 = par_ref[b, 5]
    m20 = par_ref[b, 6]; m21 = par_ref[b, 7]; m22 = par_ref[b, 8]
    t0 = par_ref[b, 9]; t1 = par_ref[b, 10]; t2 = par_ref[b, 11]
    px = d * (m00 * x + m01 * y + m02) + t0
    py = d * (m10 * x + m11 * y + m12) + t1
    pz = d * (m20 * x + m21 * y + m22) + t2
    inv = 1.0 / (pz + 1e-7)            # exact divide: sampling coords are geometry
    out_ref[0, 0] = (px * inv * (1.0 / (W - 1)) - 0.5) * 2.0
    out_ref[0, 1] = (py * inv * (1.0 / (H - 1)) - 0.5) * 2.0


def backproject_project(depth, inv_K, K, T, H, W):
    B = depth.shape[0]
    # fold (K@T)[:, :3, :3] @ invK[:, :3, :3] and the translation in glue (tiny)
    P = jnp.matmul(K, T)[:, :3, :]                                  # (B,3,4)
    M = jnp.matmul(P[:, :, :3], inv_K[:, :3, :3])                   # (B,3,3)
    t = P[:, :, 3]                                                  # (B,3)
    par = jnp.concatenate([M.reshape(B, 9), t], axis=1).astype(jnp.float32)   # (B,12)
    d = depth.reshape(B, H, W)
    out = pl.pallas_call(
        functools.partial(_bp_proj_kernel, H=H, W=W),
        out_shape=jax.ShapeDtypeStruct((B, 2, H, W), jnp.float32),
        grid=(B,),
        in_specs=[pl.BlockSpec(memory_space=pltpu.MemorySpace.SMEM),
                  pl.BlockSpec((1, H, W), lambda b: (b, 0, 0))],
        out_specs=pl.BlockSpec((1, 2, H, W), lambda b: (b, 0, 0, 0)),
        compiler_params=pltpu.CompilerParams(dimension_semantics=("parallel",)),
    )(par, d)
    return out                                                      # (B,2,H,W)


# ----------------------------------------------------------------------------
# Pallas kernel 5: reprojection loss (SSIM via separable 3x3 mean pool + L1)
# ----------------------------------------------------------------------------
def _reproj_kernel(xp_ref, yp_ref, o_ref, *, H, W):
    xp = xp_ref[...]            # (1,3,H+2,W+2), reflect-padded pred
    yp = yp_ref[...]            # (1,3,H+2,W+2), reflect-padded target
    C1 = 0.01 ** 2
    C2 = 0.03 ** 2

    def pool(a):   # separable 3x3 mean: 6 taps
        r = a[:, :, 0:H, :] + a[:, :, 1:H + 1, :] + a[:, :, 2:H + 2, :]
        return (r[:, :, :, 0:W] + r[:, :, :, 1:W + 1] + r[:, :, :, 2:W + 2]) * (1.0 / 9.0)

    mu_x = pool(xp)
    mu_y = pool(yp)
    sigma_x = pool(xp * xp) - mu_x * mu_x
    sigma_y = pool(yp * yp) - mu_y * mu_y
    sigma_xy = pool(xp * yp) - mu_x * mu_y
    ssim_n = (2 * mu_x * mu_y + C1) * (2 * sigma_xy + C2)
    ssim_d = (mu_x * mu_x + mu_y * mu_y + C1) * (sigma_x + sigma_y + C2)
    ssim = jnp.clip((1.0 - ssim_n * pl.reciprocal(ssim_d, approx=True)) * 0.5, 0.0, 1.0)
    pred = xp[:, :, 1:1 + H, 1:1 + W]
    targ = yp[:, :, 1:1 + H, 1:1 + W]
    l1 = jnp.mean(jnp.abs(targ - pred), axis=1, keepdims=True)
    ssim_m = jnp.mean(ssim, axis=1, keepdims=True)
    o_ref[...] = 0.85 * ssim_m + 0.15 * l1


def compute_reprojection_loss(pred, target):
    B, C, H, W = pred.shape
    xp = jnp.pad(pred, ((0, 0), (0, 0), (1, 1), (1, 1)), mode="reflect")
    yp = jnp.pad(target, ((0, 0), (0, 0), (1, 1), (1, 1)), mode="reflect")
    return pl.pallas_call(
        functools.partial(_reproj_kernel, H=H, W=W),
        out_shape=jax.ShapeDtypeStruct((B, 1, H, W), jnp.float32),
        grid=(B,),
        in_specs=[pl.BlockSpec((1, C, H + 2, W + 2), lambda b: (b, 0, 0, 0)),
                  pl.BlockSpec((1, C, H + 2, W + 2), lambda b: (b, 0, 0, 0))],
        out_specs=pl.BlockSpec((1, 1, H, W), lambda b: (b, 0, 0, 0)),
        compiler_params=pltpu.CompilerParams(dimension_semantics=("parallel",)),
    )(xp, yp)


# ----------------------------------------------------------------------------
# Pallas kernel 6: min over hypotheses (+noise fused) -> per-batch partial means
# and identity-selection mask; fully parallel over batch (2 TCs on v7x).
# ----------------------------------------------------------------------------
def _min_mean_kernel(i0_ref, i1_ref, r0_ref, r1_ref, nz_ref,
                     part_ref, mask_ref, *, inv_hw):
    nz = nz_ref[0]                                  # (2,H,W)
    c0 = i0_ref[0, 0] + nz[0]
    c1 = i1_ref[0, 0] + nz[1]
    c2 = r0_ref[0, 0]
    c3 = r1_ref[0, 0]
    mn = c0
    idx = jnp.zeros(mn.shape, jnp.int32)
    for k, c in ((1, c1), (2, c2), (3, c3)):
        upd = c < mn
        mn = jnp.where(upd, c, mn)
        idx = jnp.where(upd, k, idx)
    mask_ref[0] = (idx > 1).astype(jnp.float32)
    part_ref[...] = (jnp.sum(mn) * inv_hw).reshape(1, 1, 1)


def min_reprojection(id0, id1, rp0, rp1, noise):
    B, _, H, W = id0.shape
    loss_spec = pl.BlockSpec((1, 1, H, W), lambda b: (b, 0, 0, 0))
    parts, mask = pl.pallas_call(
        functools.partial(_min_mean_kernel, inv_hw=1.0 / float(H * W)),
        out_shape=(jax.ShapeDtypeStruct((B, 1, 1), jnp.float32),
                   jax.ShapeDtypeStruct((B, H, W), jnp.float32)),
        grid=(B,),
        in_specs=[loss_spec, loss_spec, loss_spec, loss_spec,
                  pl.BlockSpec((1, 2, H, W), lambda b: (b, 0, 0, 0))],
        out_specs=(pl.BlockSpec((1, 1, 1), lambda b: (b, 0, 0)),
                   pl.BlockSpec((1, H, W), lambda b: (b, 0, 0))),
        compiler_params=pltpu.CompilerParams(dimension_semantics=("parallel",)),
    )(id0, id1, rp0, rp1, noise)
    return parts, mask                               # (B,1,1), (B,H,W)


# ----------------------------------------------------------------------------
# Pallas kernel 7: edge-aware smoothness loss -> per-batch partials (parallel)
# ----------------------------------------------------------------------------
def _smooth_kernel(d_ref, img_ref, o_ref):
    d = d_ref[...]
    img = img_ref[...]
    gdx = jnp.abs(d[:, :, :, :-1] - d[:, :, :, 1:])
    gdy = jnp.abs(d[:, :, :-1, :] - d[:, :, 1:, :])
    gix = jnp.mean(jnp.abs(img[:, :, :, :-1] - img[:, :, :, 1:]), axis=1, keepdims=True)
    giy = jnp.mean(jnp.abs(img[:, :, :-1, :] - img[:, :, 1:, :]), axis=1, keepdims=True)
    val = jnp.mean(gdx * jnp.exp(-gix)) + jnp.mean(gdy * jnp.exp(-giy))
    o_ref[...] = val.reshape(1, 1, 1)


def get_smooth_loss(disp, img):
    B, Cd, H, W = disp.shape
    Ci = img.shape[1]
    parts = pl.pallas_call(
        _smooth_kernel,
        out_shape=jax.ShapeDtypeStruct((B, 1, 1), jnp.float32),
        grid=(B,),
        in_specs=[pl.BlockSpec((1, Cd, H, W), lambda b: (b, 0, 0, 0)),
                  pl.BlockSpec((1, Ci, H, W), lambda b: (b, 0, 0, 0))],
        out_specs=pl.BlockSpec((1, 1, 1), lambda b: (b, 0, 0)),
        compiler_params=pltpu.CompilerParams(dimension_semantics=("parallel",)),
    )(disp, img)
    return jnp.mean(parts)


# ----------------------------------------------------------------------------
# plain-JAX glue: pose math, K matrices, grid_sample
# ----------------------------------------------------------------------------
def rot_from_axisangle(vec):                     # (B,1,3) -> (B,4,4)
    angle = jnp.linalg.norm(vec, axis=2, keepdims=True)
    axis = vec / (angle + 1e-7)
    ca = jnp.cos(angle)
    sa = jnp.sin(angle)
    C = 1 - ca
    x = axis[..., 0:1]; y = axis[..., 1:2]; z = axis[..., 2:3]
    xs, ys_, zs = x * sa, y * sa, z * sa
    xC, yC, zC = x * C, y * C, z * C
    xyC, yzC, zxC = x * yC, y * zC, z * xC
    B = vec.shape[0]

    def s(t):
        return jnp.squeeze(t, axis=(1, 2))

    rot = jnp.zeros((B, 4, 4), jnp.float32)
    rot = rot.at[:, 0, 0].set(s(x * xC + ca)).at[:, 0, 1].set(s(xyC - zs)).at[:, 0, 2].set(s(zxC + ys_))
    rot = rot.at[:, 1, 0].set(s(xyC + zs)).at[:, 1, 1].set(s(y * yC + ca)).at[:, 1, 2].set(s(yzC - xs))
    rot = rot.at[:, 2, 0].set(s(zxC - ys_)).at[:, 2, 1].set(s(yzC + xs)).at[:, 2, 2].set(s(z * zC + ca))
    rot = rot.at[:, 3, 3].set(1.0)
    return rot


def get_translation_matrix(t):
    t = t.reshape(-1, 3)
    B = t.shape[0]
    T = jnp.tile(jnp.eye(4, dtype=jnp.float32)[None], (B, 1, 1))
    return T.at[:, :3, 3].set(t)


def transformation_from_parameters(axisangle, translation, invert=False):
    R = rot_from_axisangle(axisangle)
    t = translation
    if invert:
        R = jnp.transpose(R, (0, 2, 1))
        t = -t
    T = get_translation_matrix(t)
    return R @ T if invert else T @ R


def compute_K(fl, offsets):
    B = fl.shape[0]
    fl_diag = fl[:, :, None] * jnp.eye(2, dtype=fl.dtype)[None]          # diag_embed
    K = jnp.concatenate([fl_diag, offsets[:, :, None]], axis=2)
    row = jnp.tile(jnp.array([[0., 0., 1.], [0., 0., 0.]], fl.dtype)[None], (B, 1, 1))
    K = jnp.concatenate([K, row], axis=1)
    col = jnp.tile(jnp.array([0., 0., 0., 1.], fl.dtype).reshape(1, 4, 1), (B, 1, 1))
    return jnp.concatenate([K, col], axis=2)


def add_K(K, inputs, width, height):
    # faithful to the reference: `return` inside the loop -> only scale 0 is added
    scale = 0
    K_scale = K.at[:, 0].multiply(float(width // 2 ** scale))
    K_scale = K_scale.at[:, 1].multiply(float(height // 2 ** scale))
    inv_K_scale = jnp.linalg.pinv(K_scale)
    inputs[("K", scale)] = K_scale
    inputs[("inv_K", scale)] = inv_K_scale
    return inputs


def grid_sample_border(img, grid):
    """bilinear grid_sample, padding_mode='border', align_corners=False.
    grid: (B,2,H,W) with x in channel 0, y in channel 1."""
    B, C, H, W = img.shape
    gx, gy = grid[:, 0], grid[:, 1]
    ix = jnp.clip(((gx + 1) * W - 1) / 2, 0, W - 1)
    iy = jnp.clip(((gy + 1) * H - 1) / 2, 0, H - 1)
    x0f = jnp.floor(ix); y0f = jnp.floor(iy)
    wx1 = ix - x0f; wx0 = 1 - wx1
    wy1 = iy - y0f; wy0 = 1 - wy1
    x0 = jnp.clip(x0f, 0, W - 1).astype(jnp.int32)
    x1 = jnp.clip(x0f + 1, 0, W - 1).astype(jnp.int32)
    y0 = jnp.clip(y0f, 0, H - 1).astype(jnp.int32)
    y1 = jnp.clip(y0f + 1, 0, H - 1).astype(jnp.int32)
    flat = img.reshape(B, C, H * W)

    def gather(yi, xi):
        idx = (yi * W + xi).reshape(B, 1, -1)
        idx = jnp.broadcast_to(idx, (B, C, idx.shape[-1]))
        return jnp.take_along_axis(flat, idx, axis=2).reshape(B, C, H, W)

    out = (gather(y0, x0) * (wy0 * wx0)[:, None]
           + gather(y0, x1) * (wy0 * wx1)[:, None]
           + gather(y1, x0) * (wy1 * wx0)[:, None]
           + gather(y1, x1) * (wy1 * wx1)[:, None])
    return out


# ----------------------------------------------------------------------------
# stand-in encoder / decoders (NHWC end-to-end; all conv matmuls run in Pallas)
# ----------------------------------------------------------------------------
def encoder_forward(params, x_nhwc):
    h = (x_nhwc - 0.45) / 0.225                    # normalize=True, as in ResnetEncoder
    feats = []
    for (w, b) in params:
        h = conv2d_nhwc(h, w, b, stride=2, pad=1, act="relu")
        feats.append(h)
    return feats


def depth_decoder_forward(params, feats):
    outputs = {}
    for s in range(4):
        f = feats[s]                                              # (B,h,w,C) NHWC
        up = jnp.repeat(jnp.repeat(f, 2, axis=1), 2, axis=2)      # nearest x2
        # TODO(synk): fold the nearest x2 upsample into a fused halo-window conv.
        o = conv2d_nhwc(up, params[s][0], params[s][1], stride=1, pad=1, act="sigmoid")
        B, h2, w2, _ = o.shape
        outputs[("disp", s)] = o.reshape(B, 1, h2, w2)            # Cout=1: free NHWC->NCHW
    return outputs


def pose_decoder_forward(params, feats):
    out = conv2d_nhwc(feats[-1], params["squeeze_w"], params["squeeze_b"],
                      stride=1, pad=0, act="relu")
    out = conv2d_nhwc(out, params["p0_w"], params["p0_b"], stride=1, pad=1, act="relu")
    out = conv2d_nhwc(out, params["p1_w"], params["p1_b"], stride=1, pad=1, act="relu")
    out = conv2d_nhwc(out, params["p2_w"], params["p2_b"], stride=1, pad=1, act="none")
    out = jnp.mean(out, axis=(1, 2))                              # spatial mean -> (B,12)
    out = 0.01 * out.reshape(-1, 2, 1, 6)
    return out[..., :3], out[..., 3:]


# ----------------------------------------------------------------------------
# full forward (stage 1)
# ----------------------------------------------------------------------------
def monodepth_forward(params, inputs, cfg, noise_key):
    H, W = cfg["height"], cfg["width"]
    scales = [0, 1, 2, 3]
    frame_ids = [0, -1, 1]

    def to_nhwc(t):
        return jnp.transpose(t, (0, 2, 3, 1))

    feats = encoder_forward(params["depth_enc"], to_nhwc(inputs[("color_aug", 0, 0)]))
    outputs = depth_decoder_forward(params["depth_dec"], feats)

    pose_nhwc = {f: to_nhwc(inputs[("color_aug", f, 0)]) for f in frame_ids}
    pin1 = jnp.concatenate([pose_nhwc[-1], pose_nhwc[0]], axis=-1)
    pin2 = jnp.concatenate([pose_nhwc[0], pose_nhwc[1]], axis=-1)
    penc1 = encoder_forward(params["pose_enc"], pin1)
    penc2 = encoder_forward(params["pose_enc"], pin2)

    fl1, off1 = pooled_heads_forward(params["heads"], penc1[-1])
    fl2, off2 = pooled_heads_forward(params["heads"], penc2[-1])
    K = (compute_K(fl1, off1) + compute_K(fl2, off2)) / 2
    inputs = add_K(K, inputs, W, H)

    aa1, t1 = pose_decoder_forward(params["pose_dec"], penc1)
    aa2, t2 = pose_decoder_forward(params["pose_dec"], penc2)
    outputs[("axisangle", 0, -1)] = aa1
    outputs[("translation", 0, -1)] = t1
    outputs[("axisangle", 0, 1)] = aa2
    outputs[("translation", 0, 1)] = t2
    outputs[("cam_T_cam", 0, -1)] = transformation_from_parameters(aa1[:, 0], t1[:, 0], invert=True)
    outputs[("cam_T_cam", 0, 1)] = transformation_from_parameters(aa2[:, 0], t2[:, 0], invert=False)

    for scale in scales:
        disp = outputs[("disp", scale)]
        disp_up = jax.image.resize(disp, (disp.shape[0], 1, H, W), method="bilinear")
        depth = disp_to_depth(disp_up, cfg["min_depth"], cfg["max_depth"])
        outputs[("depth", 0, scale)] = depth
        for frame_id in frame_ids[1:]:
            T = outputs[("cam_T_cam", 0, frame_id)]
            pix = backproject_project(depth, inputs[("inv_K", 0)], inputs[("K", 0)], T, H, W)
            outputs[("sample", frame_id, scale)] = pix            # NOTE: (B,2,H,W) layout
            outputs[("color", frame_id, scale)] = grid_sample_border(
                inputs[("color", frame_id, 0)], pix)
            outputs[("color_identity", frame_id, scale)] = inputs[("color", frame_id, 0)]

    losses = {}
    total_loss = 0.0
    target = inputs[("color", 0, 0)]
    B = target.shape[0]

    # identity reprojection losses are scale-invariant -> compute once (hoisted)
    ident = [compute_reprojection_loss(inputs[("color", fid, 0)], target)
             for fid in frame_ids[1:]]                            # two (B,1,H,W)

    for scale in scales:
        disp = outputs[("disp", scale)]
        color = inputs[("color", 0, scale)]

        reproj = [compute_reprojection_loss(outputs[("color", fid, scale)], target)
                  for fid in frame_ids[1:]]                       # two (B,1,H,W)
        noise_key, sub = jax.random.split(noise_key)
        noise = jax.random.normal(sub, (B, 2, H, W), jnp.float32) * 1e-5

        parts, mask = min_reprojection(ident[0], ident[1], reproj[0], reproj[1], noise)
        outputs["identity_selection/{}".format(scale)] = mask

        loss = jnp.mean(parts)
        mean_disp = jnp.mean(disp, axis=(2, 3), keepdims=True)
        norm_disp = disp / (mean_disp + 1e-7)
        loss = loss + 1e-3 * get_smooth_loss(norm_disp, color) / (2 ** scale)

        total_loss = total_loss + loss
        losses["loss/{}".format(scale)] = loss

    total_loss = total_loss / len(scales)
    losses["loss"] = total_loss
    return outputs, losses


# ----------------------------------------------------------------------------
# deterministic parameter initialization (weights stored as (kh,kw,Cin,Cout))
# ----------------------------------------------------------------------------
def init_params(key):
    chs = [64, 64, 128, 256, 512]                 # num_ch_enc
    keys = iter(jax.random.split(key, 32))

    def conv_init(cout, cin, k):
        w = jax.random.normal(next(keys), (k, k, cin, cout), jnp.float32) * (0.5 / (cin * k * k) ** 0.5)
        return w, jnp.zeros((cout,), jnp.float32)

    def lin_init(cin, cout):
        return jax.random.normal(next(keys), (cin, cout), jnp.float32) * (0.5 / cin ** 0.5)

    depth_enc, cin = [], 3
    for c in chs:
        depth_enc.append(conv_init(c, cin, 3)); cin = c
    pose_enc, cin = [], 6
    for c in chs:
        pose_enc.append(conv_init(c, cin, 3)); cin = c
    depth_dec = [conv_init(1, chs[s], 3) for s in range(4)]
    pose_dec = {}
    pose_dec["squeeze_w"], pose_dec["squeeze_b"] = conv_init(256, 512, 1)
    pose_dec["p0_w"], pose_dec["p0_b"] = conv_init(256, 256, 3)
    pose_dec["p1_w"], pose_dec["p1_b"] = conv_init(256, 256, 3)
    pose_dec["p2_w"], pose_dec["p2_b"] = conv_init(12, 256, 3)
    heads = {
        "fl_w1": lin_init(512, 256), "fl_b1": jnp.zeros((256,), jnp.float32),
        "fl_w2": lin_init(256, 2), "fl_b2": jnp.zeros((2,), jnp.float32),
        "off_w1": lin_init(512, 256), "off_b1": jnp.zeros((256,), jnp.float32),
        "off_w2": lin_init(256, 2), "off_b2": jnp.zeros((2,), jnp.float32),
    }
    return {"depth_enc": depth_enc, "pose_enc": pose_enc, "depth_dec": depth_dec,
            "pose_dec": pose_dec, "heads": heads}


# ----------------------------------------------------------------------------
if __name__ == "__main__":
    cfg = {"height": 32, "width": 64, "batch": 2, "min_depth": 0.1, "max_depth": 100.0}
    B, H, W = cfg["batch"], cfg["height"], cfg["width"]

    key = jax.random.PRNGKey(0)
    kparam, kdata, knoise = jax.random.split(key, 3)
    params = init_params(kparam)

    inputs = {}
    dkeys = jax.random.split(kdata, 6)
    for idx, f in enumerate([0, -1, 1]):
        inputs[("color", f, 0)] = jax.random.uniform(dkeys[idx], (B, 3, H, W), jnp.float32)
        inputs[("color_aug", f, 0)] = jax.random.uniform(dkeys[idx + 3], (B, 3, H, W), jnp.float32)
    for s in range(1, 4):
        inputs[("color", 0, s)] = jax.image.resize(
            inputs[("color", 0, 0)], (B, 3, H // 2 ** s, W // 2 ** s), method="bilinear")

    outputs, losses = monodepth_forward(params, inputs, cfg, knoise)
    total = jax.block_until_ready(losses["loss"])
    assert bool(jnp.isfinite(total))
    print("KERNEL_OK")
</pallas_src>

<mosaic_0001>
module attributes {stable_mosaic.version = 11 : i64} {
  func.func @_mm_act_kernel(%arg0: i32, %arg1: i32, %arg2: i32, %arg3: memref<512x32xbf16, #tpu.memory_space<vmem>>, %arg4: memref<32x128xbf16, #tpu.memory_space<vmem>>, %arg5: memref<1x128xf32, #tpu.memory_space<vmem>>, %arg6: memref<512x128xf32, #tpu.memory_space<vmem>>, %arg7: memref<512x128xf32, #tpu.memory_space<vmem>>) attributes {dimension_semantics = [#tpu.dimension_semantics<parallel>, #tpu.dimension_semantics<parallel>, #tpu.dimension_semantics<arbitrary>], iteration_bounds = array<i64: 2, 1, 1>, scalar_prefetch = 0 : i64, scratch_operands = 1 : i64, tpu.core_type = #tpu.core_type<tc>, window_params = [{transform_indices = @transform_0, window_bounds = array<i64: 512, 32>}, {transform_indices = @transform_1, window_bounds = array<i64: 32, 128>}, {transform_indices = @transform_2, window_bounds = array<i64: 1, 128>}, {transform_indices = @transform_3, window_bounds = array<i64: 512, 128>}]} {
    %c0_i32 = arith.constant 0 : i32
    %0 = arith.cmpi eq, %arg2, %c0_i32 : i32
    %1 = arith.extui %0 : i1 to i32
    %c0_i32_0 = arith.constant 0 : i32
    %2 = arith.cmpi ne, %1, %c0_i32_0 : i32
    scf.if %2 {
      %cst_10 = arith.constant 0.000000e+00 : f32
      %12 = vector.broadcast %cst_10 : f32 to vector<512x128xf32>
      %c0_11 = arith.constant 0 : index
      %c0_12 = arith.constant 0 : index
      %13 = vector.load %arg7[%c0_11, %c0_12] : memref<512x128xf32, #tpu.memory_space<vmem>>, vector<512x128xf32>
      tpu.vector_store %arg7[%c0_11, %c0_12], %12 {strides = array<i32>} : memref<512x128xf32, #tpu.memory_space<vmem>>, vector<512x128xf32>,
    } else {
    }
    %c0 = arith.constant 0 : index
    %c0_1 = arith.constant 0 : index
    %3 = vector.load %arg7[%c0, %c0_1] : memref<512x128xf32, #tpu.memory_space<vmem>>, vector<512x128xf32>
    %c0_2 = arith.constant 0 : index
    %c0_3 = arith.constant 0 : index
    %4 = vector.load %arg3[%c0_2, %c0_3] : memref<512x32xbf16, #tpu.memory_space<vmem>>, vector<512x32xbf16>
    %c0_4 = arith.constant 0 : index
    %c0_5 = arith.constant 0 : index
    %5 = vector.load %arg4[%c0_4, %c0_5] : memref<32x128xbf16, #tpu.memory_space<vmem>>, vector<32x128xbf16>
    %cst = arith.constant dense<0.000000e+00> : vector<512x128xf32>
    %6 = tpu.matmul %4, %5, %cst {dimension_numbers = #tpu.dot_dimension_numbers<[1], [0], [0], [1], [0, 0, 1, 1], [], []>} : vector<512x32xbf16>, vector<32x128xbf16>, vector<512x128xf32> -> vector<512x128xf32>
    %7 = arith.addf %3, %6 : vector<512x128xf32>
    %c0_6 = arith.constant 0 : index
    %c0_7 = arith.constant 0 : index
    %8 = vector.load %arg7[%c0_6, %c0_7] : memref<512x128xf32, #tpu.memory_space<vmem>>, vector<512x128xf32>
    tpu.vector_store %arg7[%c0_6, %c0_7], %7 {strides = array<i32>} : memref<512x128xf32, #tpu.memory_space<vmem>>, vector<512x128xf32>,
    %c0_i32_8 = arith.constant 0 : i32
    %9 = arith.cmpi eq, %arg2, %c0_i32_8 : i32
    %10 = arith.extui %9 : i1 to i32
    %c0_i32_9 = arith.constant 0 : i32
    %11 = arith.cmpi ne, %10, %c0_i32_9 : i32
    scf.if %11 {
      %c0_10 = arith.constant 0 : index
      %c0_11 = arith.constant 0 : index
      %12 = vector.load %arg7[%c0_10, %c0_11] : memref<512x128xf32, #tpu.memory_space<vmem>>, vector<512x128xf32>
      %c0_12 = arith.constant 0 : index
      %c0_13 = arith.constant 0 : index
      %13 = vector.load %arg5[%c0_12, %c0_13] : memref<1x128xf32, #tpu.memory_space<vmem>>, vector<1x128xf32>
      %14 = vector.broadcast %13 : vector<1x128xf32> to vector<512x128xf32>
      %15 = arith.addf %12, %14 : vector<512x128xf32>
      %cst_14 = arith.constant 0.000000e+00 : f32
      %16 = vector.broadcast %cst_14 : f32 to vector<512x128xf32>
      %17 = arith.maximumf %15, %16 : vector<512x128xf32>
      %c0_15 = arith.constant 0 : index
      %c0_16 = arith.constant 0 : index
      %18 = vector.load %arg6[%c0_15, %c0_16] : memref<512x128xf32, #tpu.memory_space<vmem>>, vector<512x128xf32>
      tpu.vector_store %arg6[%c0_15, %c0_16], %17 {strides = array<i32>} : memref<512x128xf32, #tpu.memory_space<vmem>>, vector<512x128xf32>,
    } else {
    }
    return
  }
  func.func @transform_0(%arg0: i32, %arg1: i32, %arg2: i32) -> (i32, i32) {
    %c0_i32 = arith.constant 0 : i32
    return %arg0, %arg2 : i32, i32
  }
  func.func @transform_1(%arg0: i32, %arg1: i32, %arg2: i32) -> (i32, i32) {
    %c0_i32 = arith.constant 0 : i32
    return %arg2, %arg1 : i32, i32
  }
  func.func @transform_2(%arg0: i32, %arg1: i32, %arg2: i32) -> (i32, i32) {
    %c0_i32 = arith.constant 0 : i32
    %c0_i32_0 = arith.constant 0 : i32
    return %c0_i32, %arg1 : i32, i32
  }
  func.func @transform_3(%arg0: i32, %arg1: i32, %arg2: i32) -> (i32, i32) {
    %c0_i32 = arith.constant 0 : i32
    return %arg0, %arg1 : i32, i32
  }
}

</mosaic_0001>

<bundles_post_ra>
// kernel: tpu_custom_call.1
= control target key start
LH: loop header
LB: loop body
LE: loop exit
PB: predicated region body
PF: predicated region fallthrough
CT: control target
= control target key end

     0   :  { %8 = vsyncpa [#allocation4], 0  ;;  %s2098_s0 = inlined_call_operand.vmem [shape: bf16[1024,32], index: 0, kind: input, shape index: {}]   ;;  %s2099_s1 = inlined_call_operand.vmem [shape: bf16[32,128], index: 1, kind: input, shape index: {}]   ;;  %s2100_s2 = inlined_call_operand.vmem [shape: f32[1,128], index: 2, kind: input, shape index: {}]   ;;  %s2101_s3 = inlined_call_operand.hbm [shape: f32[1024,128], index: 3, kind: output, shape index: {}]  }
   0x1   :  { %10 = vsyncpa [#allocation4 + $0x1], 0  ;;  %s1790_s12 = smov 0   ;;  %s1792_s13 = smov 0  }
   0x2   :  { %s1794_s14 = smov 0   ;;  %s1796_s15 = smov 0  }
   0x3   :  { %s1798_s16 = smov 0   ;;  %s1800_s17 = smov 0  }
   0x4 LB: > { %s1406_s18 = sadd.s32 4294967295, %s1766_s17   ;;  %s1407_s19 = sadd.s32 4294967294, %s1766_s17   ;;  %s1766_s17 = sphi %s1800_s17, %s16_s17   ;;  %s1762_s16 = sphi %s1798_s16, %s2108_s16   ;;  %s1758_s15 = sphi %s1796_s15, %s2107_s15   ;;  %s1754_s14 = sphi %s1794_s14, %s2106_s14   ;;  %s1750_s13 = sphi %s1792_s13, %s2105_s13   ;;  %s1746_s12 = sphi %s1790_s12, %s2104_s12  }
   0x5   : > { %s35_s20 = sadd.s32 1, %s1762_s16  ;;  %s126_s21 = sadd.s32 1, %s1754_s14 }
   0x6   : > { %p37_p0 = scmp.ge.s32.totalorder %s35_s20, 2  ;;  %p136_p1 = scmp.ne.s32.totalorder %s1754_s14, %s1750_s13 }
   0x7   : > { %p137_p2 = scmp.eq.s32.totalorder %s1406_s18, 1  ;;  %p142_p3 = scmp.ne.s32.totalorder %s1750_s13, %s1746_s12 }
   0x8   : > { %s2110_s20 = smov (%p37_p0, %s35_s20), 0  ;;  %p143_p5 = scmp.eq.s32.totalorder %s1407_s19, 1 }
   0x9   : > { %p1830_p4 = por %p137_p2, %p136_p1  ;;  %s121_s23 = ssub.s32 %s1762_s16, %s2110_s20 }
   0xa   : > { %p1412_p6 = scmp.ge.s32.totalorder %s1766_s17, 1  ;;  %p124_p7 = scmp.eq.s32.totalorder %s121_s23, 0 }
   0xb   : > { %p1837_p8 = por %p143_p5, %p142_p3  ;;  %p191_p9 = scmp.lt.s32.totalorder %s1766_s17, 3 }
   0xc   : > { %s1843_s25 = scalar_select %p124_p7, %s1754_s14, %s126_s21  }
   0xd   : > { %p192_p10 = pnand %p1412_p6, %p191_p9 }
   0xe   : > { %s1414_s28 = sshll.u32 (!%p192_p10), %s1758_s15, 6  ;;  %s226_s8 = sand.u32 (!%p192_p10), 1, %s1750_s13  }
   0xf   : > { %195 = sbr.rel (%p192_p10) target bundleno = 290 (0x122), region = 32  ;;  %p230_p11 = scmp.lt.s32.totalorder (!%p192_p10), %s1414_s28, 127 }
  0x10   : > { %s1413_s11 = sshll.u32 (!%p192_p10), %s226_s8, 9  ;;  %s1623_s19 = sshll.u32 (!%p192_p10), %s1758_s15, 9 }
  0x11   : > { %s1931_s18 = scalar_lea.vmem (!%p192_p10), [#allocation3], %s1413_s11  ;;  %s1294_s26 = scalar_lea.hbm (!%p192_p10), %s2101_s3, %s1623_s19 }
  0x12   : > { %s1295_s27 = sshll.u32 (!%p192_p10), %s1931_s18, 4  ;;  %s1297_s15 = sshll.u32 (!%p192_p10), %s1294_s26, 4  ;;  %s1296_s27 = int_to_ptr.vmem [resolvable:$true] %s1295_s27  ;;  %s1298_s15 = int_to_ptr.hbm [resolvable:$true] %s1297_s15 }
  0x13   : > { %s1702_s29 = sshra.s32 (!%p192_p10), %s1298_s15, 4  ;;  %s1708_s6 = scalar_lea.hbm (!%p192_p10), %s2101_s3, 1024  ;;  %s1703_s29 = int_to_ptr.hbm [resolvable:$true] %s1702_s29 }
  0x14   : > { %v1622_v0 = vld [vmem:[%s2099_s1 + $0x8] sm:$0xff]  ;;  %v1621_v1 = vld [vmem:[%s2099_s1] sm:$0xff]  ;;  %s2112_s28 = smov (!%p230_p11, %s1414_s28), 127  ;;  %vm624_vm0 = vcmask 261120   ;;  %s1704_s30 = scalar_lea.hbm %s1703_s29, 512 }
  0x15   : > { %727 = vmatpush.bf16.msra.mxu0 %v1622_v0  ;;  %1624 = vmatpush.bf16.msra.mxu1 %v1622_v0  ;;  %s1415_s4 = sshll.u32 %s2112_s28, 2  ;;  %v1925_v34 = vld [vmem:[%s2100_s2] ss:$0 sm:$0xff]  ;;  %s1282_s28 = scalar_lea.sflag [#allocation4], %s226_s8 }
  0x16   : > { %1625 = vmatpush.bf16.msra.mxu2 %v1622_v0  ;;  %1626 = vmatpush.bf16.msra.mxu3 %v1622_v0  ;;  %s1855_s7 = scalar_lea.vmem %s2098_s0, %s1415_s4  ;;  %p1705_p12 = scmp.ne.s32.totalorder %s1703_s29, %s1704_s30 }
  0x17   : > { %v1589_v2 = vld [vmem:[%s1855_s7] sm:$0xff]  ;;  %v1590_v6 = vld [vmem:[%s1855_s7 + $0x8] sm:$0xff]  ;;  %v1591_v10 = vld [vmem:[%s1855_s7 + $0x10] sm:$0xff]  ;;  %p1709_p1 = scmp.lt.s32.totalorder %s1703_s29, %s2101_s3  ;;  %p1710_p2 = scmp.lt.s32.totalorder %s1708_s6, %s1704_s30 }
  0x18   : > { %v1597_v3 = vld [vmem:[%s1855_s7 + $0x40] sm:$0xff]  ;;  %v1598_v7 = vld [vmem:[%s1855_s7 + $0x48] sm:$0xff]  ;;  %v1599_v11 = vld [vmem:[%s1855_s7 + $0x50] sm:$0xff]  ;;  %p1706_p13 = pnand %p1705_p12, %p1830_p4 }
  0x19   : > { %728 = vmatpush.bf16.msra.mxu0 %v1621_v1  ;;  %1627 = vmatpush.bf16.msra.mxu1 %v1621_v1  ;;  %v1605_v4 = vld [vmem:[%s1855_s7 + $0x80] sm:$0xff]  ;;  %v1606_v8 = vld [vmem:[%s1855_s7 + $0x88] sm:$0xff]  ;;  %v1607_v12 = vld [vmem:[%s1855_s7 + $0x90] sm:$0xff]  ;;  %p1711_p3 = por %p1710_p2, %p1709_p1 }
  0x1a   : > { %1628 = vmatpush.bf16.msra.mxu2 %v1621_v1  ;;  %1629 = vmatpush.bf16.msra.mxu3 %v1621_v1  ;;  %v1613_v5 = vld [vmem:[%s1855_s7 + $0xc0] sm:$0xff]  ;;  %v1614_v9 = vld [vmem:[%s1855_s7 + $0xc8] sm:$0xff]  ;;  %v1615_v13 = vld [vmem:[%s1855_s7 + $0xd0] sm:$0xff]  ;;  %p1707_p0 = pneg %p1706_p13 }
  0x1b   : > { %v1592_v14 = vld [vmem:[%s1855_s7 + $0x18] sm:$0xff]  ;;  %v1593_v18 = vld [vmem:[%s1855_s7 + $0x20] sm:$0xff]  ;;  %v1594_v22 = vld [vmem:[%s1855_s7 + $0x28] sm:$0xff] }
  0x1c   : > { %1552 = vmatmul.msk.bf16.vlgmr.msra.gmra.mxu0 %vm624_vm0, %v1589_v2  ;;  %1560 = vmatmul.msk.bf16.vlgmr.msra.gmra.mxu1 %vm624_vm0, %v1597_v3  ;;  %v1600_v15 = vld [vmem:[%s1855_s7 + $0x58] sm:$0xff]  ;;  %v1601_v19 = vld [vmem:[%s1855_s7 + $0x60] sm:$0xff]  ;;  %v1602_v23 = vld [vmem:[%s1855_s7 + $0x68] sm:$0xff]  ;;  %p1712_p5 = pnand %p1711_p3, %p1707_p0 }
  0x1d   : > { %1568 = vmatmul.msk.bf16.vlgmr.msra.gmra.mxu2 %vm624_vm0, %v1605_v4  ;;  %1576 = vmatmul.msk.bf16.vlgmr.msra.gmra.mxu3 %vm624_vm0, %v1613_v5  ;;  %v1608_v16 = vld [vmem:[%s1855_s7 + $0x98] sm:$0xff]  ;;  %v1609_v20 = vld [vmem:[%s1855_s7 + $0xa0] sm:$0xff]  ;;  %v1610_v24 = vld [vmem:[%s1855_s7 + $0xa8] sm:$0xff] }
  0x1e   : > { %v1616_v17 = vld [vmem:[%s1855_s7 + $0xd8] sm:$0xff]  ;;  %v1617_v21 = vld [vmem:[%s1855_s7 + $0xe0] sm:$0xff]  ;;  %v1618_v25 = vld [vmem:[%s1855_s7 + $0xe8] sm:$0xff] }
  0x1f   : > { %v1595_v26 = vld [vmem:[%s1855_s7 + $0x30] sm:$0xff]  ;;  %v1596_v30 = vld [vmem:[%s1855_s7 + $0x38] sm:$0xff] }
  0x20   : > { %v1603_v27 = vld [vmem:[%s1855_s7 + $0x70] sm:$0xff]  ;;  %v1604_v31 = vld [vmem:[%s1855_s7 + $0x78] sm:$0xff] }
  0x21   : > { %v1611_v28 = vld [vmem:[%s1855_s7 + $0xb0] sm:$0xff]  ;;  %v1612_v32 = vld [vmem:[%s1855_s7 + $0xb8] sm:$0xff] }
  0x22   : > { %v1619_v29 = vld [vmem:[%s1855_s7 + $0xf0] sm:$0xff]  ;;  %v1620_v33 = vld [vmem:[%s1855_s7 + $0xf8] sm:$0xff] }
  0x2c   : > { %1553 = vmatmul.msk.bf16.gmra.mxu0 %vm624_vm0, %v1590_v6  ;;  %1561 = vmatmul.msk.bf16.gmra.mxu1 %vm624_vm0, %v1598_v7 }
  0x2d   : > { %1569 = vmatmul.msk.bf16.gmra.mxu2 %vm624_vm0, %v1606_v8  ;;  %1577 = vmatmul.msk.bf16.gmra.mxu3 %vm624_vm0, %v1614_v9 }
  0x3c   : > { %1554 = vmatmul.msk.bf16.gmra.mxu0 %vm624_vm0, %v1591_v10  ;;  %1562 = vmatmul.msk.bf16.gmra.mxu1 %vm624_vm0, %v1599_v11 }
  0x3d   : > { %1570 = vmatmul.msk.bf16.gmra.mxu2 %vm624_vm0, %v1607_v12  ;;  %1578 = vmatmul.msk.bf16.gmra.mxu3 %vm624_vm0, %v1615_v13 }
  0x4c   : > { %1555 = vmatmul.msk.bf16.gmra.mxu0 %vm624_vm0, %v1592_v14  ;;  %1563 = vmatmul.msk.bf16.gmra.mxu1 %vm624_vm0, %v1600_v15 }
  0x4d   : > { %1571 = vmatmul.msk.bf16.gmra.mxu2 %vm624_vm0, %v1608_v16  ;;  %1579 = vmatmul.msk.bf16.gmra.mxu3 %vm624_vm0, %v1616_v17 }
  0x5c   : > { %1556 = vmatmul.msk.bf16.gmra.mxu0 %vm624_vm0, %v1593_v18  ;;  %1564 = vmatmul.msk.bf16.gmra.mxu1 %vm624_vm0, %v1601_v19 }
  0x5d   : > { %1572 = vmatmul.msk.bf16.gmra.mxu2 %vm624_vm0, %v1609_v20  ;;  %1580 = vmatmul.msk.bf16.gmra.mxu3 %vm624_vm0, %v1617_v21 }
  0x6c   : > { %1557 = vmatmul.msk.bf16.gmra.mxu0 %vm624_vm0, %v1594_v22  ;;  %1565 = vmatmul.msk.bf16.gmra.mxu1 %vm624_vm0, %v1602_v23 }
  0x6d   : > { %1573 = vmatmul.msk.bf16.gmra.mxu2 %vm624_vm0, %v1610_v24  ;;  %1581 = vmatmul.msk.bf16.gmra.mxu3 %vm624_vm0, %v1618_v25 }
  0x7c   : > { %1558 = vmatmul.msk.bf16.gmra.mxu0 %vm624_vm0, %v1595_v26  ;;  %1566 = vmatmul.msk.bf16.gmra.mxu1 %vm624_vm0, %v1603_v27 }
  0x7d   : > { %1574 = vmatmul.msk.bf16.gmra.mxu2 %vm624_vm0, %v1611_v28  ;;  %1582 = vmatmul.msk.bf16.gmra.mxu3 %vm624_vm0, %v1619_v29 }
  0x8c   : > { %1559 = vmatmul.msk.bf16.gmra.mxu0 %vm624_vm0, %v1596_v30  ;;  %1567 = vmatmul.msk.bf16.gmra.mxu1 %vm624_vm0, %v1604_v31 }
  0x8d   : > { %1575 = vmatmul.msk.bf16.gmra.mxu2 %vm624_vm0, %v1612_v32  ;;  %1583 = vmatmul.msk.bf16.gmra.mxu3 %vm624_vm0, %v1620_v33 }
  0x99   : > { %v730_v35 = vpop.f32.mrf.mxu0  ;;  %v770_v36 = vpop.f32.mrf.mxu1 }
  0x9a   : > { %v1089_v37 = vadd.f32 %v1925_v34, %v730_v35  ;;  %v1105_v38 = vadd.f32 %v1925_v34, %v770_v36 }
  0x9c   : > { %v1153_v39 = vmax.f32 %v1089_v37, 0.0  ;;  %v1169_v40 = vmax.f32 %v1105_v38, 0.0 }
  0x9e   : > { %1217 = vst [vmem:[%s1931_s18] sm:$0xff] %v1153_v39 }
  0x9f   : > { %1233 = vst [vmem:[%s1931_s18 + $0x80] sm:$0xff] %v1169_v40 }
  0xa0   : > { %v810_v41 = vpop.f32.mrf.mxu2  ;;  %v850_v42 = vpop.f32.mrf.mxu3 }
  0xa1   : > { %v1121_v43 = vadd.f32 %v1925_v34, %v810_v41  ;;  %v1137_v44 = vadd.f32 %v1925_v34, %v850_v42  ;;  %v732_v45 = vpop.f32.mrf.mxu0  ;;  %v772_v46 = vpop.f32.mrf.mxu1 }
  0xa2   : > { %v1090_v47 = vadd.f32 %v1925_v34, %v732_v45  ;;  %v1106_v48 = vadd.f32 %v1925_v34, %v772_v46 }
  0xa3   : > { %v1185_v49 = vmax.f32 %v1121_v43, 0.0  ;;  %v1201_v50 = vmax.f32 %v1137_v44, 0.0 }
  0xa4   : > { %v1154_v51 = vmax.f32 %v1090_v47, 0.0  ;;  %v1170_v52 = vmax.f32 %v1106_v48, 0.0 }
  0xa5   : > { %1249 = vst [vmem:[%s1931_s18 + $0x100] sm:$0xff] %v1185_v49 }
  0xa6   : > { %1265 = vst [vmem:[%s1931_s18 + $0x180] sm:$0xff] %v1201_v50 }
  0xa7   : > { %1218 = vst [vmem:[%s1931_s18 + $0x8] sm:$0xff] %v1154_v51 }
  0xa8   : > { %1234 = vst [vmem:[%s1931_s18 + $0x88] sm:$0xff] %v1170_v52  ;;  %v812_v53 = vpop.f32.mrf.mxu2  ;;  %v852_v54 = vpop.f32.mrf.mxu3 }
  0xa9   : > { %v1122_v55 = vadd.f32 %v1925_v34, %v812_v53  ;;  %v1138_v56 = vadd.f32 %v1925_v34, %v852_v54  ;;  %v735_v57 = vpop.f32.mrf.mxu0  ;;  %v775_v58 = vpop.f32.mrf.mxu1 }
  0xaa   : > { %v1091_v59 = vadd.f32 %v1925_v34, %v735_v57  ;;  %v1107_v60 = vadd.f32 %v1925_v34, %v775_v58 }
  0xab   : > { %v1186_v61 = vmax.f32 %v1122_v55, 0.0  ;;  %v1202_v62 = vmax.f32 %v1138_v56, 0.0 }
  0xac   : > { %v1155_v63 = vmax.f32 %v1091_v59, 0.0  ;;  %v1171_v0 = vmax.f32 %v1107_v60, 0.0 }
  0xad   : > { %1250 = vst [vmem:[%s1931_s18 + $0x108] sm:$0xff] %v1186_v61 }
  0xae   : > { %1266 = vst [vmem:[%s1931_s18 + $0x188] sm:$0xff] %v1202_v62 }
  0xaf   : > { %1219 = vst [vmem:[%s1931_s18 + $0x10] sm:$0xff] %v1155_v63 }
  0xb0   : > { %1235 = vst [vmem:[%s1931_s18 + $0x90] sm:$0xff] %v1171_v0  ;;  %v815_v1 = vpop.f32.mrf.mxu2  ;;  %v855_v2 = vpop.f32.mrf.mxu3 }
  0xb1   : > { %v1123_v3 = vadd.f32 %v1925_v34, %v815_v1  ;;  %v1139_v4 = vadd.f32 %v1925_v34, %v855_v2  ;;  %v737_v5 = vpop.f32.mrf.mxu0  ;;  %v777_v6 = vpop.f32.mrf.mxu1 }
  0xb2   : > { %v1092_v7 = vadd.f32 %v1925_v34, %v737_v5  ;;  %v1108_v8 = vadd.f32 %v1925_v34, %v777_v6 }
  0xb3   : > { %v1187_v9 = vmax.f32 %v1123_v3, 0.0  ;;  %v1203_v10 = vmax.f32 %v1139_v4, 0.0 }
  0xb4   : > { %v1156_v11 = vmax.f32 %v1092_v7, 0.0  ;;  %v1172_v12 = vmax.f32 %v1108_v8, 0.0 }
  0xb5   : > { %1251 = vst [vmem:[%s1931_s18 + $0x110] sm:$0xff] %v1187_v9 }
  0xb6   : > { %1267 = vst [vmem:[%s1931_s18 + $0x190] sm:$0xff] %v1203_v10 }
  0xb7   : > { %1220 = vst [vmem:[%s1931_s18 + $0x18] sm:$0xff] %v1156_v11 }
  0xb8   : > { %1236 = vst [vmem:[%s1931_s18 + $0x98] sm:$0xff] %v1172_v12  ;;  %v817_v13 = vpop.f32.mrf.mxu2  ;;  %v857_v14 = vpop.f32.mrf.mxu3 }
  0xb9   : > { %v1124_v15 = vadd.f32 %v1925_v34, %v817_v13  ;;  %v1140_v16 = vadd.f32 %v1925_v34, %v857_v14  ;;  %v740_v17 = vpop.f32.mrf.mxu0  ;;  %v780_v18 = vpop.f32.mrf.mxu1 }
  0xba   : > { %v1093_v19 = vadd.f32 %v1925_v34, %v740_v17  ;;  %v1109_v20 = vadd.f32 %v1925_v34, %v780_v18 }
  0xbb   : > { %v1188_v21 = vmax.f32 %v1124_v15, 0.0  ;;  %v1204_v22 = vmax.f32 %v1140_v16, 0.0 }
  0xbc   : > { %v1157_v23 = vmax.f32 %v1093_v19, 0.0  ;;  %v1173_v24 = vmax.f32 %v1109_v20, 0.0 }
  0xbd   : > { %1252 = vst [vmem:[%s1931_s18 + $0x118] sm:$0xff] %v1188_v21 }
  0xbe   : > { %1268 = vst [vmem:[%s1931_s18 + $0x198] sm:$0xff] %v1204_v22 }
  0xbf   : > { %1221 = vst [vmem:[%s1931_s18 + $0x20] sm:$0xff] %v1157_v23 }
  0xc0   : > { %1237 = vst [vmem:[%s1931_s18 + $0xa0] sm:$0xff] %v1173_v24  ;;  %v820_v25 = vpop.f32.mrf.mxu2  ;;  %v860_v26 = vpop.f32.mrf.mxu3 }
  0xc1   : > { %v1125_v27 = vadd.f32 %v1925_v34, %v820_v25  ;;  %v1141_v28 = vadd.f32 %v1925_v34, %v860_v26  ;;  %v742_v29 = vpop.f32.mrf.mxu0  ;;  %v782_v30 = vpop.f32.mrf.mxu1 }
  0xc2   : > { %v1094_v31 = vadd.f32 %v1925_v34, %v742_v29  ;;  %v1110_v32 = vadd.f32 %v1925_v34, %v782_v30 }
  0xc3   : > { %v1189_v33 = vmax.f32 %v1125_v27, 0.0  ;;  %v1205_v35 = vmax.f32 %v1141_v28, 0.0 }
  0xc4   : > { %v1158_v36 = vmax.f32 %v1094_v31, 0.0  ;;  %v1174_v37 = vmax.f32 %v1110_v32, 0.0 }
  0xc5   : > { %1253 = vst [vmem:[%s1931_s18 + $0x120] sm:$0xff] %v1189_v33 }
  0xc6   : > { %1269 = vst [vmem:[%s1931_s18 + $0x1a0] sm:$0xff] %v1205_v35 }
  0xc7   : > { %1222 = vst [vmem:[%s1931_s18 + $0x28] sm:$0xff] %v1158_v36 }
  0xc8   : > { %1238 = vst [vmem:[%s1931_s18 + $0xa8] sm:$0xff] %v1174_v37  ;;  %v822_v38 = vpop.f32.mrf.mxu2  ;;  %v862_v39 = vpop.f32.mrf.mxu3 }
  0xc9   : > { %v1126_v40 = vadd.f32 %v1925_v34, %v822_v38  ;;  %v1142_v41 = vadd.f32 %v1925_v34, %v862_v39  ;;  %v745_v42 = vpop.f32.mrf.mxu0  ;;  %v785_v43 = vpop.f32.mrf.mxu1 }
  0xca   : > { %v1095_v44 = vadd.f32 %v1925_v34, %v745_v42  ;;  %v1111_v45 = vadd.f32 %v1925_v34, %v785_v43 }
  0xcb   : > { %v1190_v46 = vmax.f32 %v1126_v40, 0.0  ;;  %v1206_v47 = vmax.f32 %v1142_v41, 0.0 }
  0xcc   : > { %v1159_v48 = vmax.f32 %v1095_v44, 0.0  ;;  %v1175_v49 = vmax.f32 %v1111_v45, 0.0 }
  0xcd   : > { %1254 = vst [vmem:[%s1931_s18 + $0x128] sm:$0xff] %v1190_v46 }
  0xce   : > { %1270 = vst [vmem:[%s1931_s18 + $0x1a8] sm:$0xff] %v1206_v47 }
  0xcf   : > { %1223 = vst [vmem:[%s1931_s18 + $0x30] sm:$0xff] %v1159_v48 }
  0xd0   : > { %1239 = vst [vmem:[%s1931_s18 + $0xb0] sm:$0xff] %v1175_v49  ;;  %v825_v50 = vpop.f32.mrf.mxu2  ;;  %v865_v51 = vpop.f32.mrf.mxu3 }
  0xd1   : > { %v1127_v52 = vadd.f32 %v1925_v34, %v825_v50  ;;  %v1143_v53 = vadd.f32 %v1925_v34, %v865_v51  ;;  %v747_v54 = vpop.f32.mrf.mxu0  ;;  %v787_v55 = vpop.f32.mrf.mxu1 }
  0xd2   : > { %v1096_v56 = vadd.f32 %v1925_v34, %v747_v54  ;;  %v1112_v57 = vadd.f32 %v1925_v34, %v787_v55 }
  0xd3   : > { %v1191_v58 = vmax.f32 %v1127_v52, 0.0  ;;  %v1207_v59 = vmax.f32 %v1143_v53, 0.0 }
  0xd4   : > { %v1160_v60 = vmax.f32 %v1096_v56, 0.0  ;;  %v1176_v61 = vmax.f32 %v1112_v57, 0.0 }
  0xd5   : > { %1255 = vst [vmem:[%s1931_s18 + $0x130] sm:$0xff] %v1191_v58 }
  0xd6   : > { %1271 = vst [vmem:[%s1931_s18 + $0x1b0] sm:$0xff] %v1207_v59 }
  0xd7   : > { %1224 = vst [vmem:[%s1931_s18 + $0x38] sm:$0xff] %v1160_v60 }
  0xd8   : > { %1240 = vst [vmem:[%s1931_s18 + $0xb8] sm:$0xff] %v1176_v61  ;;  %v827_v62 = vpop.f32.mrf.mxu2  ;;  %v867_v63 = vpop.f32.mrf.mxu3 }
  0xd9   : > { %v1128_v0 = vadd.f32 %v1925_v34, %v827_v62  ;;  %v1144_v1 = vadd.f32 %v1925_v34, %v867_v63  ;;  %v750_v2 = vpop.f32.mrf.mxu0  ;;  %v790_v3 = vpop.f32.mrf.mxu1 }
  0xda   : > { %v1097_v4 = vadd.f32 %v1925_v34, %v750_v2  ;;  %v1113_v5 = vadd.f32 %v1925_v34, %v790_v3 }
  0xdb   : > { %v1192_v6 = vmax.f32 %v1128_v0, 0.0  ;;  %v1208_v7 = vmax.f32 %v1144_v1, 0.0 }
  0xdc   : > { %v1161_v8 = vmax.f32 %v1097_v4, 0.0  ;;  %v1177_v9 = vmax.f32 %v1113_v5, 0.0 }
  0xdd   : > { %1256 = vst [vmem:[%s1931_s18 + $0x138] sm:$0xff] %v1192_v6 }
  0xde   : > { %1272 = vst [vmem:[%s1931_s18 + $0x1b8] sm:$0xff] %v1208_v7 }
  0xdf   : > { %1225 = vst [vmem:[%s1931_s18 + $0x40] sm:$0xff] %v1161_v8 }
  0xe0   : > { %1241 = vst [vmem:[%s1931_s18 + $0xc0] sm:$0xff] %v1177_v9  ;;  %v830_v10 = vpop.f32.mrf.mxu2  ;;  %v870_v11 = vpop.f32.mrf.mxu3 }
  0xe1   : > { %v1129_v12 = vadd.f32 %v1925_v34, %v830_v10  ;;  %v1145_v13 = vadd.f32 %v1925_v34, %v870_v11  ;;  %v752_v14 = vpop.f32.mrf.mxu0  ;;  %v792_v15 = vpop.f32.mrf.mxu1 }
  0xe2   : > { %v1098_v16 = vadd.f32 %v1925_v34, %v752_v14  ;;  %v1114_v17 = vadd.f32 %v1925_v34, %v792_v15 }
  0xe3   : > { %v1193_v18 = vmax.f32 %v1129_v12, 0.0  ;;  %v1209_v19 = vmax.f32 %v1145_v13, 0.0 }
  0xe4   : > { %v1162_v20 = vmax.f32 %v1098_v16, 0.0  ;;  %v1178_v21 = vmax.f32 %v1114_v17, 0.0 }
  0xe5   : > { %1257 = vst [vmem:[%s1931_s18 + $0x140] sm:$0xff] %v1193_v18 }
  0xe6   : > { %1273 = vst [vmem:[%s1931_s18 + $0x1c0] sm:$0xff] %v1209_v19 }
  0xe7   : > { %1226 = vst [vmem:[%s1931_s18 + $0x48] sm:$0xff] %v1162_v20 }
  0xe8   : > { %1242 = vst [vmem:[%s1931_s18 + $0xc8] sm:$0xff] %v1178_v21  ;;  %v832_v22 = vpop.f32.mrf.mxu2  ;;  %v872_v23 = vpop.f32.mrf.mxu3 }
  0xe9   : > { %v1130_v24 = vadd.f32 %v1925_v34, %v832_v22  ;;  %v1146_v25 = vadd.f32 %v1925_v34, %v872_v23  ;;  %v755_v26 = vpop.f32.mrf.mxu0  ;;  %v795_v27 = vpop.f32.mrf.mxu1 }
  0xea   : > { %v1099_v28 = vadd.f32 %v1925_v34, %v755_v26  ;;  %v1115_v29 = vadd.f32 %v1925_v34, %v795_v27 }
  0xeb   : > { %v1194_v30 = vmax.f32 %v1130_v24, 0.0  ;;  %v1210_v31 = vmax.f32 %v1146_v25, 0.0 }
  0xec   : > { %v1163_v32 = vmax.f32 %v1099_v28, 0.0  ;;  %v1179_v33 = vmax.f32 %v1115_v29, 0.0 }
  0xed   : > { %1258 = vst [vmem:[%s1931_s18 + $0x148] sm:$0xff] %v1194_v30 }
  0xee   : > { %1274 = vst [vmem:[%s1931_s18 + $0x1c8] sm:$0xff] %v1210_v31 }
  0xef   : > { %1227 = vst [vmem:[%s1931_s18 + $0x50] sm:$0xff] %v1163_v32 }
  0xf0   : > { %1243 = vst [vmem:[%s1931_s18 + $0xd0] sm:$0xff] %v1179_v33  ;;  %v835_v35 = vpop.f32.mrf.mxu2  ;;  %v875_v36 = vpop.f32.mrf.mxu3 }
  0xf1   : > { %v1131_v37 = vadd.f32 %v1925_v34, %v835_v35  ;;  %v1147_v38 = vadd.f32 %v1925_v34, %v875_v36  ;;  %v757_v39 = vpop.f32.mrf.mxu0  ;;  %v797_v40 = vpop.f32.mrf.mxu1 }
  0xf2   : > { %v1100_v41 = vadd.f32 %v1925_v34, %v757_v39  ;;  %v1116_v42 = vadd.f32 %v1925_v34, %v797_v40 }
  0xf3   : > { %v1195_v43 = vmax.f32 %v1131_v37, 0.0  ;;  %v1211_v44 = vmax.f32 %v1147_v38, 0.0 }
  0xf4   : > { %v1164_v45 = vmax.f32 %v1100_v41, 0.0  ;;  %v1180_v46 = vmax.f32 %v1116_v42, 0.0 }
  0xf5   : > { %1259 = vst [vmem:[%s1931_s18 + $0x150] sm:$0xff] %v1195_v43 }
  0xf6   : > { %1275 = vst [vmem:[%s1931_s18 + $0x1d0] sm:$0xff] %v1211_v44 }
  0xf7   : > { %1228 = vst [vmem:[%s1931_s18 + $0x58] sm:$0xff] %v1164_v45 }
  0xf8   : > { %1244 = vst [vmem:[%s1931_s18 + $0xd8] sm:$0xff] %v1180_v46  ;;  %v837_v47 = vpop.f32.mrf.mxu2  ;;  %v877_v48 = vpop.f32.mrf.mxu3 }
  0xf9   : > { %v1132_v49 = vadd.f32 %v1925_v34, %v837_v47  ;;  %v1148_v50 = vadd.f32 %v1925_v34, %v877_v48  ;;  %v760_v51 = vpop.f32.mrf.mxu0  ;;  %v800_v52 = vpop.f32.mrf.mxu1 }
  0xfa   : > { %v1101_v53 = vadd.f32 %v1925_v34, %v760_v51  ;;  %v1117_v54 = vadd.f32 %v1925_v34, %v800_v52 }
  0xfb   : > { %v1196_v55 = vmax.f32 %v1132_v49, 0.0  ;;  %v1212_v56 = vmax.f32 %v1148_v50, 0.0 }
  0xfc   : > { %v1165_v57 = vmax.f32 %v1101_v53, 0.0  ;;  %v1181_v58 = vmax.f32 %v1117_v54, 0.0 }
  0xfd   : > { %1260 = vst [vmem:[%s1931_s18 + $0x158] sm:$0xff] %v1196_v55 }
  0xfe   : > { %1276 = vst [vmem:[%s1931_s18 + $0x1d8] sm:$0xff] %v1212_v56 }
  0xff   : > { %1229 = vst [vmem:[%s1931_s18 + $0x60] sm:$0xff] %v1165_v57 }
 0x100   : > { %1245 = vst [vmem:[%s1931_s18 + $0xe0] sm:$0xff] %v1181_v58  ;;  %v840_v59 = vpop.f32.mrf.mxu2  ;;  %v880_v60 = vpop.f32.mrf.mxu3 }
 0x101   : > { %v1133_v61 = vadd.f32 %v1925_v34, %v840_v59  ;;  %v1149_v62 = vadd.f32 %v1925_v34, %v880_v60  ;;  %v762_v63 = vpop.f32.mrf.mxu0  ;;  %v802_v0 = vpop.f32.mrf.mxu1 }
 0x102   : > { %v1102_v1 = vadd.f32 %v1925_v34, %v762_v63  ;;  %v1118_v2 = vadd.f32 %v1925_v34, %v802_v0 }
 0x103   : > { %v1197_v3 = vmax.f32 %v1133_v61, 0.0  ;;  %v1213_v4 = vmax.f32 %v1149_v62, 0.0 }
 0x104   : > { %v1166_v5 = vmax.f32 %v1102_v1, 0.0  ;;  %v1182_v6 = vmax.f32 %v1118_v2, 0.0 }
 0x105   : > { %1261 = vst [vmem:[%s1931_s18 + $0x160] sm:$0xff] %v1197_v3 }
 0x106   : > { %1277 = vst [vmem:[%s1931_s18 + $0x1e0] sm:$0xff] %v1213_v4 }
 0x107   : > { %1230 = vst [vmem:[%s1931_s18 + $0x68] sm:$0xff] %v1166_v5 }
 0x108   : > { %1246 = vst [vmem:[%s1931_s18 + $0xe8] sm:$0xff] %v1182_v6  ;;  %v842_v7 = vpop.f32.mrf.mxu2  ;;  %v882_v8 = vpop.f32.mrf.mxu3 }
 0x109   : > { %v1134_v9 = vadd.f32 %v1925_v34, %v842_v7  ;;  %v1150_v10 = vadd.f32 %v1925_v34, %v882_v8  ;;  %v765_v11 = vpop.f32.mrf.mxu0  ;;  %v805_v12 = vpop.f32.mrf.mxu1 }
 0x10a   : > { %v1103_v13 = vadd.f32 %v1925_v34, %v765_v11  ;;  %v1119_v14 = vadd.f32 %v1925_v34, %v805_v12 }
 0x10b   : > { %v1198_v15 = vmax.f32 %v1134_v9, 0.0  ;;  %v1214_v16 = vmax.f32 %v1150_v10, 0.0 }
 0x10c   : > { %v1167_v17 = vmax.f32 %v1103_v13, 0.0  ;;  %v1183_v18 = vmax.f32 %v1119_v14, 0.0 }
 0x10d   : > { %1262 = vst [vmem:[%s1931_s18 + $0x168] sm:$0xff] %v1198_v15 }
 0x10e   : > { %1278 = vst [vmem:[%s1931_s18 + $0x1e8] sm:$0xff] %v1214_v16 }
 0x10f   : > { %1231 = vst [vmem:[%s1931_s18 + $0x70] sm:$0xff] %v1167_v17 }
 0x110   : > { %1247 = vst [vmem:[%s1931_s18 + $0xf0] sm:$0xff] %v1183_v18  ;;  %v845_v19 = vpop.f32.mrf.mxu2  ;;  %v885_v20 = vpop.f32.mrf.mxu3 }
 0x111   : > { %v1135_v21 = vadd.f32 %v1925_v34, %v845_v19  ;;  %v1151_v22 = vadd.f32 %v1925_v34, %v885_v20  ;;  %v767_v23 = vpop.f32.mrf.mxu0  ;;  %v807_v24 = vpop.f32.mrf.mxu1 }
 0x112   : > { %v1104_v25 = vadd.f32 %v1925_v34, %v767_v23  ;;  %v1120_v26 = vadd.f32 %v1925_v34, %v807_v24 }
 0x113   : > { %v1199_v27 = vmax.f32 %v1135_v21, 0.0  ;;  %v1215_v28 = vmax.f32 %v1151_v22, 0.0 }
 0x114   : > { %v1168_v29 = vmax.f32 %v1104_v25, 0.0  ;;  %v1184_v30 = vmax.f32 %v1120_v26, 0.0 }
 0x115   : > { %1263 = vst [vmem:[%s1931_s18 + $0x170] sm:$0xff] %v1199_v27 }
 0x116   : > { %1279 = vst [vmem:[%s1931_s18 + $0x1f0] sm:$0xff] %v1215_v28 }
 0x117   : > { %1232 = vst [vmem:[%s1931_s18 + $0x78] sm:$0xff] %v1168_v29 }
 0x118   : > { %1248 = vst [vmem:[%s1931_s18 + $0xf8] sm:$0xff] %v1184_v30  ;;  %v847_v31 = vpop.f32.mrf.mxu2  ;;  %v887_v32 = vpop.f32.mrf.mxu3 }
 0x119   : > { %v1136_v33 = vadd.f32 %v1925_v34, %v847_v31  ;;  %v1152_v35 = vadd.f32 %v1925_v34, %v887_v32 }
 0x11b   : > { %v1200_v36 = vmax.f32 %v1136_v33, 0.0  ;;  %v1216_v37 = vmax.f32 %v1152_v35, 0.0 }
 0x11d   : > { %1264 = vst [vmem:[%s1931_s18 + $0x178] sm:$0xff] %v1200_v36 }
 0x11e   : > { %1280 = vst [vmem:[%s1931_s18 + $0x1f8] sm:$0xff] %v1216_v37 }
 0x11f   : > { %1715 = shalt.err (!%p1712_p5)
}
 0x120   : > { %s1768_s8 = smov 128   ;;  %s1769_s10 = smov 8  }
 0x121   : > { %1630 = dma.vmem_to_hbm [thread:$0]  (%p1830_p4), %s1296_s27, 8192, %s1298_s15, %s1282_s28, %s1768_s8, %s1768_s8, %s1769_s10  }
 0x122 PF: > { %p1636_p6 = scmp.ge.s32.totalorder %s1766_s17, 2  ;;  %s1312_s11 = sand.u32 1, %s1746_s12  }
 0x123   : > { %s1313_s18 = scalar_lea.sflag [#allocation4], %s1312_s11 }
 0x124   : > { %p1633_p7 = pnand %p1636_p6, %p1837_p8 }
 0x126   : > { %p1634_p9 = pneg %p1633_p7 }
 0x128   : > { %1741 = dma.done.wait (%p1634_p9), %s1313_s18, 8192  }
 0x129   : > { %1743 = vsyncadd (%p1634_p9), %s1313_s18, 4294959104  ;;  %s16_s17 = sadd.s32 1, %s1766_s17   ;;  %s2104_s12 = smov %s1750_s13 }
 0x12a   : > { %p13_p10 = scmp.ge.s32.totalorder %s16_s17, 4   ;;  %s2105_s13 = smov %s1754_s14 }
 0x12b   : > { %s2106_s14 = smov %s1843_s25  ;;  %s2107_s15 = smov %s1762_s16 }
 0x12c   : > { %s2108_s16 = smov %s2110_s20  ;;  %15 = sbr.rel (!%p13_p10) target bundleno = 4 (0x4), region = 81 }
 0x131   :  { %1319 = vsyncpa [#allocation4], 1 }
 0x132   :  { %1321 = vsyncpa [#allocation4 + $0x1], 1 }

</bundles_post_ra>
